<compile_context>
chip_gen: v7x
topology: tpu7x:2x2x1
jax: 0.10.0
libtpu: 0.0.40
codegen_flags: <defaults>
</compile_context>

<pallas_src>
import jax
import jax.numpy as jnp
from jax.experimental import pallas as pl
from jax.experimental.pallas import tpu as pltpu


_TARGET_CHUNK_BYTES = 8 * 1024 * 1024   # ~8 MiB per DMA chunk (big bursts)
_MIN_BYTES_FOR_RING = 2 * 1024 * 1024   # above this, keep several DMAs in flight
_RING = 4                               # max concurrent HBM->HBM DMAs
_MAX_CHUNKS = 32                        # bound on static unroll of the chunk loop


def _packed_sublanes(itemsize: int) -> int:
    # Sublane-tile height: 8 rows for 32-bit, 16 for 16-bit, 32 for 8-bit dtypes.
    return {4: 8, 2: 16, 1: 32}.get(itemsize, 8)


def _plan_chunks(rows: int, lanes: int, itemsize: int):
    """Static (row_start, n_rows) chunks of a (rows, lanes) slab + ring depth."""
    row_bytes = lanes * itemsize
    total_bytes = rows * row_bytes
    packed = _packed_sublanes(itemsize)

    desired = -(-total_bytes // _TARGET_CHUNK_BYTES)          # ceil
    if total_bytes >= _MIN_BYTES_FOR_RING:
        desired = max(desired, _RING)                         # several DMAs in flight
    n_chunks = max(1, min(_MAX_CHUNKS, rows, desired))

    chunk_rows = -(-rows // n_chunks)
    if rows >= packed:
        chunk_rows = -(-chunk_rows // packed) * packed        # tile-aligned chunk starts

    chunks = []
    r = 0
    while r < rows:
        nr = min(chunk_rows, rows - r)
        chunks.append((r, nr))
        r += nr
    return tuple(chunks), min(_RING, len(chunks))


def _make_chunked_dma_kernel(chunks, ring):
    """Identity copy as a static ring of direct HBM->HBM DMAs (<= `ring` in flight)."""

    def kernel(x_hbm, o_hbm, sems):
        def copy(c):
            start, nrows = chunks[c]
            return pltpu.make_async_copy(
                x_hbm.at[pl.ds(start, nrows)],
                o_hbm.at[pl.ds(start, nrows)],
                sems.at[c % ring],
            )

        for c in range(len(chunks)):
            if c >= ring:                 # free this semaphore slot before reuse
                copy(c - ring).wait()
            copy(c).start()
        for c in range(max(0, len(chunks) - ring), len(chunks)):
            copy(c).wait()

    return kernel


def _whole_ref_dma_kernel(x_hbm, o_hbm, sem):
    # Rare ragged path (element count not a multiple of 128): one whole-ref DMA.
    cp = pltpu.make_async_copy(x_hbm, o_hbm, sem.at[0])
    cp.start()
    cp.wait()


def _dma_copy(arr: jax.Array, kernel, ring: int) -> jax.Array:
    return pl.pallas_call(
        kernel,
        out_shape=jax.ShapeDtypeStruct(arr.shape, arr.dtype),
        in_specs=[pl.BlockSpec(memory_space=pl.ANY)],
        out_specs=pl.BlockSpec(memory_space=pl.ANY),
        scratch_shapes=[pltpu.SemaphoreType.DMA((ring,))],
    )(arr)


def unsqueeze_last(x: jax.Array) -> jax.Array:
    """Pallas-backed equivalent of torch.Tensor.unsqueeze(-1)."""
    out_shape = x.shape + (1,)
    n = x.size
    if n == 0 or x.ndim == 0:
        return jnp.reshape(x, out_shape)      # nothing to copy

    itemsize = jnp.dtype(x.dtype).itemsize

    # Pick a 2-D slab view (rows, lanes) of x for chunked copying.  Prefer
    # keeping the original last dim (cheapest reshape) when it is already a
    # multiple of 128; otherwise fold the flat element count onto 128 lanes.
    lanes = None
    if x.ndim >= 2 and x.shape[-1] % 128 == 0:
        lanes = x.shape[-1]                   # collapse leading dims only
    elif n % 128 == 0:
        lanes = 128

    if lanes is None:
        # Ragged element count: copy x as-is with a single whole-ref DMA
        # (no pad / copy / slice round-trips through HBM).
        out = _dma_copy(x, _whole_ref_dma_kernel, 1)
        return jnp.reshape(out, out_shape)

    rows = n // lanes
    slab = jnp.reshape(x, (rows, lanes))
    chunks, ring = _plan_chunks(rows, lanes, itemsize)
    out = _dma_copy(slab, _make_chunked_dma_kernel(chunks, ring), ring)
    # NOTE: if the caller donates x (jax.jit(..., donate_argnums=0)) the copy
    # could be elided entirely (unsqueeze is metadata-only).  We intentionally
    # do NOT set input_output_aliases: without donation it forces XLA to
    # insert a defensive copy of x, adding a full extra HBM read+write pass.
    return jnp.reshape(out, out_shape)


if __name__ == "__main__":
    key = jax.random.PRNGKey(0)
    x = jax.random.normal(key, (2, 4, 16, 16), dtype=jnp.float32)

    y = jax.jit(unsqueeze_last)(x)
    jax.block_until_ready(y)

    # Sanity checks against the reference semantics of x.unsqueeze(-1).
    assert y.shape == (2, 4, 16, 16, 1), y.shape
    assert y.dtype == x.dtype
    assert bool(jnp.all(y[..., 0] == x))

    print("KERNEL_OK")
</pallas_src>

<mosaic_0001>
module attributes {stable_mosaic.version = 11 : i64} {
  func.func @kernel(%arg0: memref<16x128xf32, #tpu.memory_space<any>>, %arg1: memref<16x128xf32, #tpu.memory_space<any>>, %arg2: memref<1x!tpu.dma_semaphore, #tpu.memory_space<semaphore_mem>>) attributes {dimension_semantics = [], scalar_prefetch = 0 : i64, scratch_operands = 1 : i64, tpu.core_type = #tpu.core_type<tc>} {
    %c0_i32 = arith.constant 0 : i32
    %c0_i32_0 = arith.constant 0 : i32
    %c0_i32_1 = arith.constant 0 : i32
    %0 = tpu.memref_slice %arg0[%c0_i32_0, %c0_i32_1] : memref<16x128xf32, #tpu.memory_space<any>> -> memref<16x128xf32, #tpu.memory_space<any>>
    %c0_i32_2 = arith.constant 0 : i32
    %c0_i32_3 = arith.constant 0 : i32
    %1 = tpu.memref_slice %arg1[%c0_i32_2, %c0_i32_3] : memref<16x128xf32, #tpu.memory_space<any>> -> memref<16x128xf32, #tpu.memory_space<any>>
    %2 = tpu.memref_slice %arg2[%c0_i32] : memref<1x!tpu.dma_semaphore, #tpu.memory_space<semaphore_mem>> -> memref<1x!tpu.dma_semaphore, #tpu.memory_space<semaphore_mem>>
    %3 = tpu.memref_squeeze %2 : memref<1x!tpu.dma_semaphore, #tpu.memory_space<semaphore_mem>> -> memref<!tpu.dma_semaphore, #tpu.memory_space<semaphore_mem>>
    tpu.enqueue_dma source(%0 : memref<16x128xf32, #tpu.memory_space<any>>) target(%1 : memref<16x128xf32, #tpu.memory_space<any>>) target_semaphore(%3 : memref<!tpu.dma_semaphore, #tpu.memory_space<semaphore_mem>>)
    %c0_i32_4 = arith.constant 0 : i32
    %c0_i32_5 = arith.constant 0 : i32
    %c0_i32_6 = arith.constant 0 : i32
    %4 = tpu.memref_slice %arg0[%c0_i32_5, %c0_i32_6] : memref<16x128xf32, #tpu.memory_space<any>> -> memref<16x128xf32, #tpu.memory_space<any>>
    %c0_i32_7 = arith.constant 0 : i32
    %c0_i32_8 = arith.constant 0 : i32
    %5 = tpu.memref_slice %arg1[%c0_i32_7, %c0_i32_8] : memref<16x128xf32, #tpu.memory_space<any>> -> memref<16x128xf32, #tpu.memory_space<any>>
    %6 = tpu.memref_slice %arg2[%c0_i32_4] : memref<1x!tpu.dma_semaphore, #tpu.memory_space<semaphore_mem>> -> memref<1x!tpu.dma_semaphore, #tpu.memory_space<semaphore_mem>>
    %7 = tpu.memref_squeeze %6 : memref<1x!tpu.dma_semaphore, #tpu.memory_space<semaphore_mem>> -> memref<!tpu.dma_semaphore, #tpu.memory_space<semaphore_mem>>
    tpu.wait_dma2 semaphore(%7 : memref<!tpu.dma_semaphore, #tpu.memory_space<semaphore_mem>>) src(%4 : memref<16x128xf32, #tpu.memory_space<any>>) dst(%5 : memref<16x128xf32, #tpu.memory_space<any>>)
    return
  }
}

</mosaic_0001>

<bundles_post_ra>
// kernel: unsqueeze_last.1
= control target key start
LH: loop header
LB: loop body
LE: loop exit
PB: predicated region body
PF: predicated region fallthrough
CT: control target
= control target key end

     0   :  { %s92_s0 = inlined_call_operand.vmem [shape: f32[16,128], index: 0, kind: input, shape index: {}]   ;;  %s93_s1 = inlined_call_operand.vmem [shape: f32[16,128], index: 1, kind: output, shape index: {}]  }
   0x1   :  { %v38_v0 = vld [vmem:[%s92_s0] sm:$0xff]  ;;  %v40_v1 = vld [vmem:[%s92_s0 + $0x8] sm:$0xff] }
   0x2   :  { %39 = vst [vmem:[%s93_s1] sm:$0xff] %v38_v0  ;;  %41 = vst [vmem:[%s93_s1 + $0x8] sm:$0xff] %v40_v1 }
   0x3   :  { %49 = vsyncadd [#allocation2], 256 }
   0x4   :  { %68 = dma.done.wait [#allocation2], 256 }
   0x5   :  { %69 = vsyncadd [#allocation2], 4294967040 }
   0x6   :  { %53 = vsyncmov [#allocation2] }
   0x9   :  { %s54_s14 = vpop.sfrf %53 }
   0xa   :  { %p67_p0 = scmp.ne.s32.totalorder %s54_s14, 0 }
   0xc   :  { %58 = shalt.err (%p67_p0)  }

</bundles_post_ra>
